<compile_context>
chip_gen: v5e
topology: v5e:2x2
jax: 0.10.0
libtpu: 0.0.40
codegen_flags: <defaults>
</compile_context>

<pallas_src>
import jax
import jax.numpy as jnp
from jax.experimental import pallas as pl
from jax.experimental.pallas import tpu as pltpu


def dqn_kernel(x_ref, w1_ref, b1_ref, w2_ref, b2_ref, w3_ref, b3_ref, o_ref):
    # fc1 + relu : (TILE_B, IN) bf16 @ (IN, H1) bf16 -> f32 accumulate
    h1 = jnp.dot(x_ref[...], w1_ref[...], preferred_element_type=jnp.float32)
    h1 = jnp.maximum(h1 + b1_ref[...], 0.0).astype(jnp.bfloat16)
    # fc2 + relu : (TILE_B, H1) bf16 @ (H1, H2) bf16 -> f32 accumulate
    h2 = jnp.dot(h1, w2_ref[...], preferred_element_type=jnp.float32)
    h2 = jnp.maximum(h2 + b2_ref[...], 0.0)
    # fc3 (H2 -> 1), computed transposed so the result is lane-dense (1, TILE_B):
    # (1, H2) f32 @ (H2, TILE_B) f32 -> (1, TILE_B); avoids masked 1-of-128-lane stores.
    out = jnp.dot(w3_ref[...], h2.T, preferred_element_type=jnp.float32)
    o_ref[...] = (out + b3_ref[...]).astype(o_ref.dtype)


def dqn_forward(x, w1, b1, w2, b2, w3, b3, *, tile_b=1024):
    batch, in_dim = x.shape
    h1_dim = w1.shape[1]
    h2_dim = w2.shape[1]
    assert w3.shape == (1, h2_dim) and b3.shape == (1, 1)

    # Batch tile: multiple of 128 (lane-dense output), capped at tile_b, never larger
    # than the 128-rounded batch (so small batches don't over-pad).
    tb = min(tile_b, pl.cdiv(batch, 128) * 128)
    b_pad = pl.cdiv(batch, tb) * tb
    num_tiles = b_pad // tb

    if b_pad != batch:
        x = jnp.pad(x, ((0, b_pad - batch), (0, 0)))

    # bf16 for the bandwidth-dominant operands; biases / output stay f32.
    x_bf = x.astype(jnp.bfloat16)
    w1_bf = w1.astype(jnp.bfloat16)
    w2_bf = w2.astype(jnp.bfloat16)

    resident = lambda shape: pl.BlockSpec(shape, lambda i: (0, 0))

    out = pl.pallas_call(
        dqn_kernel,
        out_shape=jax.ShapeDtypeStruct((1, b_pad), jnp.float32),
        grid=(num_tiles,),
        in_specs=[
            pl.BlockSpec((tb, in_dim), lambda i: (i, 0)),    # x: tiled over batch
            resident((in_dim, h1_dim)),                      # w1 (resident)
            resident((1, h1_dim)),                           # b1
            resident((h1_dim, h2_dim)),                      # w2
            resident((1, h2_dim)),                           # b2
            resident((1, h2_dim)),                           # w3 row: (out=1, in) layout
            resident((1, 1)),                                # b3
        ],
        out_specs=pl.BlockSpec((1, tb), lambda i: (0, i)),   # lane-dense output row
        compiler_params=pltpu.CompilerParams(
            dimension_semantics=("parallel",)),
    )(x_bf, w1_bf, b1, w2_bf, b2, w3, b3)

    return out[0, :batch].reshape(batch, 1)


def init_params(key, state_dim, action_dim):
    """Deterministic init mirroring nn.Linear shapes.

    w1, w2 stored as (in_features, out_features); w3 stored as a (1, in_features) row
    (PyTorch fc3.weight layout) to feed the transposed final matmul.
    """
    in1, out1 = state_dim + action_dim, state_dim
    in2, out2 = state_dim, action_dim
    in3 = action_dim
    k1, k2, k3, k4, k5, k6 = jax.random.split(key, 6)

    def uinit(k, shape, fan_in):
        bound = 1.0 / jnp.sqrt(fan_in)
        return jax.random.uniform(k, shape, jnp.float32, -bound, bound)

    w1 = uinit(k1, (in1, out1), in1)
    b1 = uinit(k2, (1, out1), in1)
    w2 = uinit(k3, (in2, out2), in2)
    b2 = uinit(k4, (1, out2), in2)
    w3 = uinit(k5, (1, in3), in3)     # (out=1, in=action_dim) row
    b3 = uinit(k6, (1, 1), in3)
    return w1, b1, w2, b2, w3, b3


if __name__ == "__main__":
    state_dim = 32
    action_dim = 16
    batch = 8

    key = jax.random.PRNGKey(0)
    kx, kp = jax.random.split(key)
    x = jax.random.normal(kx, (batch, state_dim + action_dim), jnp.float32)
    params = init_params(kp, state_dim, action_dim)

    out = jax.block_until_ready(dqn_forward(x, *params))

    # Reference in plain JAX with matching bf16 input/weight precision, f32 accumulation.
    w1, b1, w2, b2, w3, b3 = params
    xb, w1b, w2b = (a.astype(jnp.bfloat16) for a in (x, w1, w2))
    h1 = jnp.maximum(jnp.dot(xb, w1b, preferred_element_type=jnp.float32) + b1, 0.0)
    h1 = h1.astype(jnp.bfloat16)
    h2 = jnp.maximum(jnp.dot(h1, w2b, preferred_element_type=jnp.float32) + b2, 0.0)
    ref = h2 @ w3.T + b3

    assert out.shape == (batch, 1)
    assert jnp.allclose(out, ref, atol=2e-3, rtol=2e-3), (out, ref)

    print("KERNEL_OK")
</pallas_src>

<mosaic_0001>
module attributes {stable_mosaic.version = 11 : i64} {
  func.func @dqn_kernel(%arg0: i32, %arg1: memref<128x48xbf16, #tpu.memory_space<vmem>>, %arg2: memref<48x32xbf16, #tpu.memory_space<vmem>>, %arg3: memref<1x32xf32, #tpu.memory_space<vmem>>, %arg4: memref<32x16xbf16, #tpu.memory_space<vmem>>, %arg5: memref<1x16xf32, #tpu.memory_space<vmem>>, %arg6: memref<1x16xf32, #tpu.memory_space<vmem>>, %arg7: memref<1x1xf32, #tpu.memory_space<vmem>>, %arg8: memref<1x128xf32, #tpu.memory_space<vmem>>) attributes {dimension_semantics = [#tpu.dimension_semantics<parallel>], iteration_bounds = array<i64: 1>, scalar_prefetch = 0 : i64, scratch_operands = 0 : i64, tpu.core_type = #tpu.core_type<tc>, window_params = [{transform_indices = @transform_0, window_bounds = array<i64: 128, 48>}, {pipeline_mode = #tpu.pipeline_mode<synchronous>, transform_indices = @transform_1, window_bounds = array<i64: 48, 32>}, {pipeline_mode = #tpu.pipeline_mode<synchronous>, transform_indices = @transform_2, window_bounds = array<i64: 1, 32>}, {pipeline_mode = #tpu.pipeline_mode<synchronous>, transform_indices = @transform_3, window_bounds = array<i64: 32, 16>}, {pipeline_mode = #tpu.pipeline_mode<synchronous>, transform_indices = @transform_4, window_bounds = array<i64: 1, 16>}, {pipeline_mode = #tpu.pipeline_mode<synchronous>, transform_indices = @transform_5, window_bounds = array<i64: 1, 16>}, {pipeline_mode = #tpu.pipeline_mode<synchronous>, transform_indices = @transform_6, window_bounds = array<i64: 1, 1>}, {transform_indices = @transform_7, window_bounds = array<i64: 1, 128>}]} {
    %c0 = arith.constant 0 : index
    %c0_0 = arith.constant 0 : index
    %0 = vector.load %arg1[%c0, %c0_0] : memref<128x48xbf16, #tpu.memory_space<vmem>>, vector<128x48xbf16>
    %c0_1 = arith.constant 0 : index
    %c0_2 = arith.constant 0 : index
    %1 = vector.load %arg2[%c0_1, %c0_2] : memref<48x32xbf16, #tpu.memory_space<vmem>>, vector<48x32xbf16>
    %cst = arith.constant dense<0.000000e+00> : vector<128x32xf32>
    %2 = tpu.matmul %0, %1, %cst {dimension_numbers = #tpu.dot_dimension_numbers<[1], [0], [0], [1], [0, 0, 1, 1], [], []>} : vector<128x48xbf16>, vector<48x32xbf16>, vector<128x32xf32> -> vector<128x32xf32>
    %c0_3 = arith.constant 0 : index
    %c0_4 = arith.constant 0 : index
    %3 = vector.load %arg3[%c0_3, %c0_4] : memref<1x32xf32, #tpu.memory_space<vmem>>, vector<1x32xf32>
    %4 = vector.broadcast %3 : vector<1x32xf32> to vector<128x32xf32>
    %5 = arith.addf %2, %4 : vector<128x32xf32>
    %cst_5 = arith.constant 0.000000e+00 : f32
    %6 = vector.broadcast %cst_5 : f32 to vector<128x32xf32>
    %7 = arith.maximumf %5, %6 : vector<128x32xf32>
    %8 = arith.truncf %7 : vector<128x32xf32> to vector<128x32xbf16>
    %c0_6 = arith.constant 0 : index
    %c0_7 = arith.constant 0 : index
    %9 = vector.load %arg4[%c0_6, %c0_7] : memref<32x16xbf16, #tpu.memory_space<vmem>>, vector<32x16xbf16>
    %cst_8 = arith.constant dense<0.000000e+00> : vector<128x16xf32>
    %10 = tpu.matmul %8, %9, %cst_8 {dimension_numbers = #tpu.dot_dimension_numbers<[1], [0], [0], [1], [0, 0, 1, 1], [], []>} : vector<128x32xbf16>, vector<32x16xbf16>, vector<128x16xf32> -> vector<128x16xf32>
    %c0_9 = arith.constant 0 : index
    %c0_10 = arith.constant 0 : index
    %11 = vector.load %arg5[%c0_9, %c0_10] : memref<1x16xf32, #tpu.memory_space<vmem>>, vector<1x16xf32>
    %12 = vector.broadcast %11 : vector<1x16xf32> to vector<128x16xf32>
    %13 = arith.addf %10, %12 : vector<128x16xf32>
    %cst_11 = arith.constant 0.000000e+00 : f32
    %14 = vector.broadcast %cst_11 : f32 to vector<128x16xf32>
    %15 = arith.maximumf %13, %14 : vector<128x16xf32>
    %c0_12 = arith.constant 0 : index
    %c0_13 = arith.constant 0 : index
    %16 = vector.load %arg6[%c0_12, %c0_13] : memref<1x16xf32, #tpu.memory_space<vmem>>, vector<1x16xf32>
    %17 = tpu.transpose %15, [1, 0] : vector<128x16xf32> -> vector<16x128xf32>
    %cst_14 = arith.constant dense<0.000000e+00> : vector<1x128xf32>
    %18 = tpu.matmul %16, %17, %cst_14 {dimension_numbers = #tpu.dot_dimension_numbers<[1], [0], [0], [1], [0, 0, 1, 1], [], []>} : vector<1x16xf32>, vector<16x128xf32>, vector<1x128xf32> -> vector<1x128xf32>
    %c0_15 = arith.constant 0 : index
    %c0_16 = arith.constant 0 : index
    %19 = vector.load %arg7[%c0_15, %c0_16] : memref<1x1xf32, #tpu.memory_space<vmem>>, vector<1x1xf32>
    %20 = vector.broadcast %19 : vector<1x1xf32> to vector<1x128xf32>
    %21 = arith.addf %18, %20 : vector<1x128xf32>
    %c0_17 = arith.constant 0 : index
    %c0_18 = arith.constant 0 : index
    %22 = vector.load %arg8[%c0_17, %c0_18] : memref<1x128xf32, #tpu.memory_space<vmem>>, vector<1x128xf32>
    tpu.vector_store %arg8[%c0_17, %c0_18], %21 {strides = array<i32>} : memref<1x128xf32, #tpu.memory_space<vmem>>, vector<1x128xf32>,
    return
  }
  func.func @transform_0(%arg0: i32) -> (i32, i32) {
    %c0_i32 = arith.constant 0 : i32
    %c0_i32_0 = arith.constant 0 : i32
    return %arg0, %c0_i32 : i32, i32
  }
  func.func @transform_1(%arg0: i32) -> (i32, i32) {
    %c0_i32 = arith.constant 0 : i32
    %c0_i32_0 = arith.constant 0 : i32
    %c0_i32_1 = arith.constant 0 : i32
    return %c0_i32, %c0_i32_0 : i32, i32
  }
  func.func @transform_2(%arg0: i32) -> (i32, i32) {
    %c0_i32 = arith.constant 0 : i32
    %c0_i32_0 = arith.constant 0 : i32
    %c0_i32_1 = arith.constant 0 : i32
    return %c0_i32, %c0_i32_0 : i32, i32
  }
  func.func @transform_3(%arg0: i32) -> (i32, i32) {
    %c0_i32 = arith.constant 0 : i32
    %c0_i32_0 = arith.constant 0 : i32
    %c0_i32_1 = arith.constant 0 : i32
    return %c0_i32, %c0_i32_0 : i32, i32
  }
  func.func @transform_4(%arg0: i32) -> (i32, i32) {
    %c0_i32 = arith.constant 0 : i32
    %c0_i32_0 = arith.constant 0 : i32
    %c0_i32_1 = arith.constant 0 : i32
    return %c0_i32, %c0_i32_0 : i32, i32
  }
  func.func @transform_5(%arg0: i32) -> (i32, i32) {
    %c0_i32 = arith.constant 0 : i32
    %c0_i32_0 = arith.constant 0 : i32
    %c0_i32_1 = arith.constant 0 : i32
    return %c0_i32, %c0_i32_0 : i32, i32
  }
  func.func @transform_6(%arg0: i32) -> (i32, i32) {
    %c0_i32 = arith.constant 0 : i32
    %c0_i32_0 = arith.constant 0 : i32
    %c0_i32_1 = arith.constant 0 : i32
    return %c0_i32, %c0_i32_0 : i32, i32
  }
  func.func @transform_7(%arg0: i32) -> (i32, i32) {
    %c0_i32 = arith.constant 0 : i32
    %c0_i32_0 = arith.constant 0 : i32
    return %c0_i32, %arg0 : i32, i32
  }
}

</mosaic_0001>

<bundles_post_ra>
// kernel: tpu_custom_call.1
= control target key start
LH: loop header
LB: loop body
LE: loop exit
PB: predicated region body
PF: predicated region fallthrough
CT: control target
= control target key end

     0   :  { %s676_s0 = inlined_call_operand.vmem [shape: bf16[128,48], index: 0, kind: input, shape index: {}]   ;;  %s677_s1 = inlined_call_operand.vmem [shape: bf16[48,32], index: 1, kind: input, shape index: {}]   ;;  %s678_s2 = inlined_call_operand.vmem [shape: f32[1,32], index: 2, kind: input, shape index: {}]   ;;  %s679_s3 = inlined_call_operand.vmem [shape: bf16[32,16], index: 3, kind: input, shape index: {}]   ;;  %s680_s4 = inlined_call_operand.vmem [shape: f32[1,16], index: 4, kind: input, shape index: {}]   ;;  %s681_s5 = inlined_call_operand.vmem [shape: f32[1,16], index: 5, kind: input, shape index: {}]   ;;  %s682_s6 = inlined_call_operand.<no memory space> [shape: f32[1,1], index: 6, kind: input, shape index: {}]   ;;  %s683_s7 = inlined_call_operand.hbm [shape: f32[1,128], index: 7, kind: output, shape index: {}]  }
   0x1   :  { %v12_v0 = vstv %s682_s6 }
   0x2   :  { %13 = vst [vmem:[#allocation2] sm:$0x1] %v12_v0 }
   0x3   :  { %v514_v1 = vld [vmem:[%s677_s1 + $0x10] sm:$0xff]  ;;  %v513_v2 = vld [vmem:[%s677_s1 + $0x8] sm:$0xff] }
   0x4   :  { %144 = vmatpush.bf16.msra.mxu0 %v514_v1  ;;  %517 = vmatpush.bf16.msra.mxu3 %v514_v1 }
   0x5   :  { %14 = vsyncpa [#allocation4], 0  ;;  %v512_v3 = vld [vmem:[%s677_s1] sm:$0xff]  ;;  %v509_v5 = vld [vmem:[%s676_s0 + $0x28] sm:$0xff]  ;;  %vm114_vm0 = vcmask 392192   ;;  %vm232_vm1 = vcmask 261120  }
   0x6   :  { %v504_v4 = vld [vmem:[%s676_s0] sm:$0xff]  ;;  %v505_v6 = vld [vmem:[%s676_s0 + $0x8] sm:$0xff]  ;;  %v510_v7 = vld [vmem:[%s676_s0 + $0x30] sm:$0xff]  ;;  %vm330_vm2 = vcmask 130048   ;;  %s556_s29 = smov [#allocation3]   ;;  %s410_s6 = sshll.u32 %s683_s7, 4  ;;  %s411_s6 = int_to_ptr.hbm [resolvable:$true] %s410_s6 }
   0x7   :  { %v506_v8 = vld [vmem:[%s676_s0 + $0x10] sm:$0xff]  ;;  %v511_v9 = vld [vmem:[%s676_s0 + $0x38] sm:$0xff]  ;;  %v508_v11 = vld [vmem:[%s676_s0 + $0x20] sm:$0xff]  ;;  %s408_s30 = sshll.u32 %s556_s29, 4  ;;  %s409_s30 = int_to_ptr.vmem [resolvable:$true] %s408_s30 }
   0x8   :  { %145 = vmatpush.bf16.msra.mxu0 %v513_v2  ;;  %518 = vmatpush.bf16.msra.mxu3 %v513_v2  ;;  %v507_v10 = vld [vmem:[%s676_s0 + $0x18] sm:$0xff]  ;;  %v516_v12 = vld [vmem:[%s679_s3 + $0x8] sm:$0xff]  ;;  %v515_v13 = vld [vmem:[%s679_s3] sm:$0xff] }
   0x9   :  { %263 = vmatpush.bf16.msra.mxu1 %v516_v12  ;;  %520 = vmatpush.bf16.msra.mxu2 %v516_v12  ;;  %v527_v15 = vld [vmem:[%s678_s2] ss:$0 sm:$0xff] }
   0xc   :  { %146 = vmatpush.bf16.msra.mxu0 %v512_v3  ;;  %519 = vmatpush.bf16.msra.mxu3 %v512_v3 }
   0xd   :  { %264 = vmatpush.bf16.msra.mxu1 %v515_v13  ;;  %522 = vmatpush.bf16.msra.mxu2 %v515_v13 }
   0xf   :  { %463 = vmatmul.msk.bf16.vlgmr.msra.gmra.mxu0 %vm114_vm0, %v504_v4  ;;  %468 = vmatmul.msk.bf16.vlgmr.msra.gmra.mxu3 %vm114_vm0, %v509_v5 }
  0x10   :  { %521 = vmatpush.bf16.msrb.mxu3 %v516_v12  ;;  %v528_v12 = vld [vmem:[%s680_s4] ss:$0 sm:$0xff] }
  0x14   :  { %523 = vmatpush.bf16.msrb.mxu3 %v515_v13 }
  0x1f   :  { %464 = vmatmul.msk.bf16.gmra.mxu0 %vm114_vm0, %v505_v6  ;;  %469 = vmatmul.msk.bf16.gmra.mxu3 %vm114_vm0, %v510_v7 }
  0x2f   :  { %465 = vmatmul.msk.bf16.gmra.mxu0 %vm114_vm0, %v506_v8  ;;  %470 = vmatmul.msk.bf16.gmra.mxu3 %vm114_vm0, %v511_v9 }
  0x3f   :  { %466 = vmatmul.msk.bf16.gmra.mxu0 %vm114_vm0, %v507_v10 }
  0x4f   :  { %467 = vmatmul.msk.bf16.gmra.mxu0 %vm114_vm0, %v508_v11 }
  0x8c   :  { %v148_v14 = vpop.f32.mrf.mxu0 }
  0x8d   :  { %v149_v17 = vadd.f32 %v527_v15, %v148_v14 }
  0x8f   :  { %v188_v20 = vmax.f32 %v149_v17, 0.0 }
  0x92   :  { %v173_v16 = vpop.f32.mrf.mxu3 }
  0x93   :  { %v174_v21 = vadd.f32 %v527_v15, %v173_v16 }
  0x94   :  { %v150_v18 = vpop.f32.mrf.mxu0 }
  0x95   :  { %v151_v19 = vadd.f32 %v527_v15, %v150_v18  ;;  %v198_v25 = vmax.f32 %v174_v21, 0.0 }
  0x97   :  { %v189_v22 = vmax.f32 %v151_v19, 0.0 }
  0x99   :  { %v204_v23 = vpack.c.bf16 %v189_v22, %v188_v20 }
  0x9a   :  { %v175_v24 = vpop.f32.mrf.mxu3 }
  0x9b   :  { %v176_v26 = vadd.f32 %v527_v15, %v175_v24  ;;  %479 = vmatmul.msk.bf16.vlgmr.msra.gmra.mxu1 %vm232_vm1, %v204_v23 }
  0x9c   :  { %v153_v27 = vpop.f32.mrf.mxu0 }
  0x9d   :  { %v199_v28 = vmax.f32 %v176_v26, 0.0  ;;  %v154_v31 = vadd.f32 %v527_v15, %v153_v27 }
  0x9f   :  { %v209_v29 = vpack.c.bf16 %v199_v28, %v198_v25  ;;  %v190_v34 = vmax.f32 %v154_v31, 0.0 }
  0xa2   :  { %v178_v30 = vpop.f32.mrf.mxu3 }
  0xa3   :  { %v179_v35 = vadd.f32 %v527_v15, %v178_v30 }
  0xa4   :  { %v155_v32 = vpop.f32.mrf.mxu0 }
  0xa5   :  { %v156_v33 = vadd.f32 %v527_v15, %v155_v32  ;;  %v200_v39 = vmax.f32 %v179_v35, 0.0 }
  0xa7   :  { %v191_v36 = vmax.f32 %v156_v33, 0.0 }
  0xa9   :  { %v205_v37 = vpack.c.bf16 %v191_v36, %v190_v34 }
  0xaa   :  { %v180_v38 = vpop.f32.mrf.mxu3 }
  0xab   :  { %v181_v40 = vadd.f32 %v527_v15, %v180_v38  ;;  %480 = vmatmul.msk.bf16.gmra.mxu1 %vm232_vm1, %v205_v37 }
  0xac   :  { %v158_v41 = vpop.f32.mrf.mxu0 }
  0xad   :  { %v201_v42 = vmax.f32 %v181_v40, 0.0  ;;  %v159_v45 = vadd.f32 %v527_v15, %v158_v41 }
  0xaf   :  { %v210_v43 = vpack.c.bf16 %v201_v42, %v200_v39  ;;  %v192_v48 = vmax.f32 %v159_v45, 0.0  ;;  %v323_v42 = vld [vmem:[#allocation2] sm:$0x1] }
  0xb1   :  { %485 = vmatmul.msk.bf16.vlgmr.msrb.gmra.mxu3 %vm232_vm1, %v210_v43  ;;  %v555_v43 = vmov 0  }
  0xb2   :  { %v183_v44 = vpop.f32.mrf.mxu3  ;;  %526 = vset.pattern.permute.xlu0 %v555_v43 }
  0xb3   :  { %v184_v49 = vadd.f32 %v527_v15, %v183_v44  ;;  %326 = vperm.xlu0 %526, %v323_v42  }
  0xb4   :  { %v160_v46 = vpop.f32.mrf.mxu0 }
  0xb5   :  { %v161_v47 = vadd.f32 %v527_v15, %v160_v46  ;;  %v202_v53 = vmax.f32 %v184_v49, 0.0 }
  0xb7   :  { %v193_v50 = vmax.f32 %v161_v47, 0.0 }
  0xb9   :  { %v206_v51 = vpack.c.bf16 %v193_v50, %v192_v48 }
  0xba   :  { %v185_v52 = vpop.f32.mrf.mxu3 }
  0xbb   :  { %v186_v54 = vadd.f32 %v527_v15, %v185_v52  ;;  %481 = vmatmul.msk.bf16.vlgmr.msra.gmra.mxu2 %vm232_vm1, %v206_v51 }
  0xbc   :  { %v163_v55 = vpop.f32.mrf.mxu0 }
  0xbd   :  { %v203_v56 = vmax.f32 %v186_v54, 0.0  ;;  %v164_v58 = vadd.f32 %v527_v15, %v163_v55 }
  0xbf   :  { %v211_v57 = vpack.c.bf16 %v203_v56, %v202_v53  ;;  %v194_v61 = vmax.f32 %v164_v58, 0.0  ;;  %v322_v58 = vld [vmem:[%s681_s5] sm:$0x1] }
  0xc1   :  { %486 = vmatmul.msk.bf16.gmra.mxu3 %vm232_vm1, %v211_v57 }
  0xc4   :  { %v165_v59 = vpop.f32.mrf.mxu0 }
  0xc5   :  { %v166_v60 = vadd.f32 %v527_v15, %v165_v59 }
  0xc7   :  { %v195_v62 = vmax.f32 %v166_v60, 0.0 }
  0xc9   :  { %v207_v63 = vpack.c.bf16 %v195_v62, %v194_v61 }
  0xcb   :  { %482 = vmatmul.msk.bf16.gmra.mxu2 %vm232_vm1, %v207_v63 }
  0xcc   :  { %v168_v0 = vpop.f32.mrf.mxu0 }
  0xcd   :  { %v169_v1 = vadd.f32 %v527_v15, %v168_v0 }
  0xcf   :  { %v196_v4 = vmax.f32 %v169_v1, 0.0 }
  0xd4   :  { %v170_v2 = vpop.f32.mrf.mxu0 }
  0xd5   :  { %v171_v3 = vadd.f32 %v527_v15, %v170_v2 }
  0xd7   :  { %v197_v5 = vmax.f32 %v171_v3, 0.0 }
  0xd9   :  { %v208_v6 = vpack.c.bf16 %v197_v5, %v196_v4 }
  0xdb   :  { %483 = vmatmul.msk.bf16.gmra.mxu2 %vm232_vm1, %v208_v6 }
  0xeb   :  { %484 = vmatmul.msk.bf16.gmra.mxu2 %vm232_vm1, %v209_v29 }
 0x118   :  { %v266_v27 = vpop.f32.mrf.mxu1 }
 0x119   :  { %v267_v55 = vadd.f32 %v528_v12, %v266_v27 }
 0x11b   :  { %v306_v57 = vmax.f32 %v267_v55, 0.0 }
 0x120   :  { %v268_v34 = vpop.f32.mrf.mxu1 }
 0x121   :  { %v269_v53 = vadd.f32 %v528_v12, %v268_v34 }
 0x123   :  { %v307_v56 = vmax.f32 %v269_v53, 0.0 }
 0x125   :  { %v327_v59 = vpop.permute.xlu0 %326 }
 0x126   :  { %v329_v60 = vperm.slane %v327_v59, 0 }
 0x128   :  { %v271_v39 = vpop.f32.mrf.mxu1 }
 0x129   :  { %v272_v51 = vadd.f32 %v528_v12, %v271_v39 }
 0x12b   :  { %v308_v54 = vmax.f32 %v272_v51, 0.0 }
 0x130   :  { %v273_v48 = vpop.f32.mrf.mxu1 }
 0x131   :  { %v274_v49 = vadd.f32 %v528_v12, %v273_v48 }
 0x133   :  { %v309_v52 = vmax.f32 %v274_v49, 0.0 }
 0x134   :  { %v296_v7 = vpop.f32.mrf.mxu3 }
 0x135   :  { %v297_v21 = vadd.f32 %v528_v12, %v296_v7 }
 0x137   :  { %v318_v23 = vmax.f32 %v297_v21, 0.0 }
 0x13c   :  { %v298_v8 = vpop.f32.mrf.mxu3 }
 0x13d   :  { %v299_v19 = vadd.f32 %v528_v12, %v298_v8 }
 0x13e   :  { %v276_v9 = vpop.f32.mrf.mxu2 }
 0x13f   :  { %v319_v22 = vmax.f32 %v299_v19, 0.0  ;;  %v277_v46 = vadd.f32 %v528_v12, %v276_v9 }
 0x141   :  { %v310_v50 = vmax.f32 %v277_v46, 0.0 }
 0x144   :  { %v301_v10 = vpop.f32.mrf.mxu3 }
 0x145   :  { %v302_v14 = vadd.f32 %v528_v12, %v301_v10 }
 0x146   :  { %v278_v11 = vpop.f32.mrf.mxu2 }
 0x147   :  { %v320_v18 = vmax.f32 %v302_v14, 0.0  ;;  %v279_v44 = vadd.f32 %v528_v12, %v278_v11 }
 0x149   :  { %v311_v47 = vmax.f32 %v279_v44, 0.0 }
 0x14c   :  { %v303_v13 = vpop.f32.mrf.mxu3 }
 0x14d   :  { %v304_v16 = vadd.f32 %v528_v12, %v303_v13 }
 0x14e   :  { %v281_v15 = vpop.f32.mrf.mxu2 }
 0x14f   :  { %v321_v17 = vmax.f32 %v304_v16, 0.0  ;;  %v282_v40 = vadd.f32 %v528_v12, %v281_v15 }
 0x151   :  { %487 = vmatpush.xpose.msk.msrb.mxu2 %vm330_vm2, %v321_v17  ;;  %v312_v45 = vmax.f32 %v282_v40, 0.0 }
 0x155   :  { %488 = vmatpush.xpose.msk.msrb.mxu2 %vm330_vm2, %v320_v18 }
 0x156   :  { %v283_v20 = vpop.f32.mrf.mxu2 }
 0x157   :  { %v284_v37 = vadd.f32 %v528_v12, %v283_v20 }
 0x159   :  { %489 = vmatpush.xpose.msk.msrb.mxu2 %vm330_vm2, %v319_v22  ;;  %v313_v41 = vmax.f32 %v284_v37, 0.0 }
 0x15d   :  { %490 = vmatpush.xpose.msk.msrb.mxu2 %vm330_vm2, %v318_v23 }
 0x15e   :  { %v286_v24 = vpop.f32.mrf.mxu2 }
 0x15f   :  { %v287_v35 = vadd.f32 %v528_v12, %v286_v24 }
 0x161   :  { %v314_v38 = vmax.f32 %v287_v35, 0.0 }
 0x166   :  { %v288_v25 = vpop.f32.mrf.mxu2 }
 0x167   :  { %v289_v32 = vadd.f32 %v528_v12, %v288_v25 }
 0x169   :  { %v315_v36 = vmax.f32 %v289_v32, 0.0 }
 0x16e   :  { %v291_v26 = vpop.f32.mrf.mxu2 }
 0x16f   :  { %v292_v30 = vadd.f32 %v528_v12, %v291_v26 }
 0x171   :  { %v316_v33 = vmax.f32 %v292_v30, 0.0 }
 0x176   :  { %v293_v28 = vpop.f32.mrf.mxu2 }
 0x177   :  { %v294_v29 = vadd.f32 %v528_v12, %v293_v28 }
 0x179   :  { %v317_v31 = vmax.f32 %v294_v29, 0.0 }
 0x17b   :  { %491 = vmatpush.xpose.msk.msrb.mxu2 %vm330_vm2, %v317_v31 }
 0x17f   :  { %492 = vmatpush.xpose.msk.msrb.mxu2 %vm330_vm2, %v316_v33 }
 0x183   :  { %493 = vmatpush.xpose.msk.msrb.mxu2 %vm330_vm2, %v315_v36 }
 0x187   :  { %494 = vmatpush.xpose.msk.msrb.mxu2 %vm330_vm2, %v314_v38 }
 0x18b   :  { %495 = vmatpush.xpose.msk.msrb.mxu2 %vm330_vm2, %v313_v41 }
 0x18f   :  { %496 = vmatpush.xpose.msk.msrb.mxu2 %vm330_vm2, %v312_v45 }
 0x193   :  { %497 = vmatpush.xpose.msk.msrb.mxu2 %vm330_vm2, %v311_v47 }
 0x197   :  { %498 = vmatpush.xpose.msk.msrb.mxu2 %vm330_vm2, %v310_v50 }
 0x19b   :  { %499 = vmatpush.xpose.msk.msrb.mxu2 %vm330_vm2, %v309_v52 }
 0x19f   :  { %500 = vmatpush.xpose.msk.msrb.mxu2 %vm330_vm2, %v308_v54 }
 0x1a3   :  { %501 = vmatpush.xpose.msk.msrb.mxu2 %vm330_vm2, %v307_v56 }
 0x1a7   :  { %502 = vmatpush.xpose.msk.msrb.mxu2 %vm330_vm2, %v306_v57 }
 0x1aa   :  { %503 = vmatmul.msk.f32.vlgmr.msrb.gmra.mxu2 %vm330_vm2, %v322_v58 }
 0x22d   :  { %v399_v61 = vpop.f32.mrf.mxu2 }
 0x22e   :  { %v400_v62 = vadd.f32 %v399_v61, %v329_v60 }
 0x230   :  { %402 = vst [vmem:[#allocation3] sm:$0x1] %v400_v62 }
 0x231   :  { %413 = dma.vmem_to_hbm [thread:$0]  %s409_s30, 16, %s411_s6, [#allocation4]  }
 0x232   :  { %553 = dma.done.wait [#allocation4], 16  }
 0x233   :  { %554 = vsyncadd [#allocation4], 4294967280 }
 0x234   :  { %418 = vsyncpa [#allocation4], 1 }

</bundles_post_ra>
